<compile_context>
chip_gen: v7x
topology: tpu7x:2x2x1
jax: 0.10.0
libtpu: 0.0.40
codegen_flags: <defaults>
</compile_context>

<pallas_src>
import functools

import jax
import jax.numpy as jnp
from jax.experimental import pallas as pl
from jax.experimental.pallas import tpu as pltpu


def _fire_kernel(x_ref, wsq_ref, bsq_ref, wcat_ref, bcat_ref, mask_ref,
                 sel_ref, out_ref, *, img_w, img_hw, nb):
    # x_ref: (Cin, nb*HW) bf16 — nb images concatenated on the lane axis.
    lanes = nb * img_hw

    x = x_ref[...]                                   # (Cin, nb*HW)  bf16
    wsq = wsq_ref[...]                               # (Csq_pad, Cin) bf16
    bsq = bsq_ref[...]                               # (Csq_pad, 1)   f32
    wcat = wcat_ref[...]                             # (Cout_pad, 9*Csq_pad) bf16
    bcat = bcat_ref[...]                             # (Cout_pad, 1)  f32
    masks = mask_ref[...]                            # (9, nb*HW) 0/1 f32
    sel = sel_ref[...].astype(jnp.float32)           # (HW, HpWp) 0/1, upcast once

    def shift_lanes(a, off):
        # result[..., p] = a[..., (p + off) mod lanes]   (XLU lane rotation)
        if off == 0:
            return a
        return pltpu.roll(a, shift=(-off) % lanes, axis=1)

    # --- squeeze 1x1 conv + ReLU: one wide bf16 MXU dot over nb*HW lanes ----
    sq = jnp.dot(wsq, x, preferred_element_type=jnp.float32)
    sq = jnp.maximum(sq + bsq, 0.0)                  # (Csq_pad, nb*HW) f32

    # --- im2col stack of the 9 zero-padded 3x3 taps (lane rolls + masks).
    #     Cross-image / wrap-around leakage only hits masked positions. ------
    pieces = []
    for ky in range(3):
        for kx in range(3):
            s = ky * 3 + kx
            off = (ky - 1) * img_w + (kx - 1)
            piece = shift_lanes(sq, off)
            if off != 0:
                piece = piece * masks[s:s + 1, :]
            pieces.append(piece)
    stack = jnp.concatenate(pieces, axis=0).astype(jnp.bfloat16)  # (9*Csq_pad, L)

    # --- fused expand1x1 | expand3x3 (+ channel concat), bias, ReLU ---------
    cat = jnp.dot(wcat, stack, preferred_element_type=jnp.float32)
    cat = jnp.maximum(cat + bcat, 0.0)               # (Cout_pad, nb*HW) f32

    # --- 2x2 max-pool: pair-max along x then y.  The kept (even, even)
    #     positions never pull data across an image boundary. ----------------
    px = jnp.maximum(cat, shift_lanes(cat, 1))
    py = jnp.maximum(px, shift_lanes(px, img_w))     # (Cout_pad, nb*HW) f32

    # --- per-image compaction with an exact 0/1 selection dot (f32), writing
    #     into a lane-dense (Cout, nb*HpWp) output block. nb is small (<= 8).
    hpwp = sel_ref.shape[1]
    cout = out_ref.shape[0]
    for b in range(nb):
        py_b = py[:, b * img_hw:(b + 1) * img_hw]    # contiguous lane slice
        pooled = jnp.dot(py_b, sel, preferred_element_type=jnp.float32)
        out_ref[:, b * hpwp:(b + 1) * hpwp] = pooled[:cout].astype(out_ref.dtype)


def _round_up(v, m):
    return (v + m - 1) // m * m


def _pick_batch_block(n, cin, cout, hw, hpwp, *, max_nb=8, vmem_budget=8 << 20):
    """Largest batch block nb (divisor of n, <= max_nb) whose double-buffered
    input/output blocks fit the VMEM budget and whose block widths are
    lane-dense (multiples of 128).  Falls back to the full batch (nb == n),
    which is always a legal full-array block.
    TODO(synk): on v7x prefer an even number (>=2) of grid steps so both
    TensorCores get work; on single-TC v5e/v6e the largest fitting block wins.
    """
    def fits(nb):
        blk = 2 * (cin * nb * hw * 2 + cout * nb * hpwp * 4)   # 2x-buffered
        return blk <= vmem_budget

    cands = [d for d in range(1, min(n, max_nb) + 1)
             if n % d == 0 and fits(d)
             and (d == n or ((d * hw) % 128 == 0 and (d * hpwp) % 128 == 0))]
    return max(cands) if cands else n


def cn_encoder_squeeze_pallas(x_nchw, wsq, bsq, w1, b1, w3, b3,
                              pooling_factor=2):
    """x_nchw: (N, Cin, H, W). Weights in PyTorch Conv2d layout (O, I, kh, kw)."""
    assert pooling_factor == 2, "kernel hard-codes 2x2 max pooling"
    n, cin, h, w = x_nchw.shape
    assert h % 2 == 0 and w % 2 == 0, "H and W must be even for 2x2 pooling"
    csq = wsq.shape[0]
    cout2 = w1.shape[0]
    cout = 2 * cout2
    hp, wp = h // 2, w // 2
    hw, hpwp = h * w, hp * wp
    f32, bf16 = jnp.float32, jnp.bfloat16

    csq_pad = _round_up(csq, 8)     # f32 sublane granule -> aligned im2col concat
    cout_pad = _round_up(cout, 8)

    # ---- input layout: (N,Cin,H,W) -> (Cin, N*HW), bf16 (one XLA transpose) -
    x = (x_nchw.reshape(n, cin, hw).transpose(1, 0, 2)
         .reshape(cin, n * hw).astype(bf16))

    # ---- packed parameters (tiny, built once at trace time) -----------------
    wsq_m = jnp.zeros((csq_pad, cin), f32).at[:csq].set(
        wsq[:, :, 0, 0].astype(f32)).astype(bf16)
    bsq_m = jnp.zeros((csq_pad, 1), f32).at[:csq, 0].set(bsq.astype(f32))

    # Combined expand weight: rows [e1 | e3]; columns = 9 taps x Csq_pad chans.
    # The 1x1 weights occupy the centre tap (ky=kx=1 -> tap index 4).
    w1_taps = jnp.zeros((cout2, 9, csq_pad), f32).at[:, 4, :csq].set(
        w1[:, :, 0, 0].astype(f32))
    w3_taps = jnp.zeros((cout2, 9, csq_pad), f32).at[:, :, :csq].set(
        jnp.transpose(w3.astype(f32), (0, 2, 3, 1)).reshape(cout2, 9, csq))
    wcat_m = jnp.zeros((cout_pad, 9 * csq_pad), f32).at[:cout].set(
        jnp.concatenate([w1_taps, w3_taps], axis=0).reshape(cout, 9 * csq_pad)
    ).astype(bf16)
    bcat_m = jnp.zeros((cout_pad, 1), f32).at[:cout, 0].set(
        jnp.concatenate([b1, b3]).astype(f32))

    nb = _pick_batch_block(n, cin, cout, hw, hpwp)
    assert n % nb == 0
    grid = (n // nb,)

    # Zero-padding masks for the 9 taps, tiled per image along the lane axis.
    p = jnp.arange(hw)
    yy0, xx0 = p // w, p % w
    mask_rows = []
    for ky in range(3):
        for kx in range(3):
            yy = yy0 + (ky - 1)
            xx = xx0 + (kx - 1)
            valid = (yy >= 0) & (yy < h) & (xx >= 0) & (xx < w)
            mask_rows.append(valid.astype(f32))
    masks = jnp.tile(jnp.stack(mask_rows, axis=0), (1, nb))     # (9, nb*HW)

    # Per-image 0/1 selection matrix compacting the 2x2-pool maxima
    # (stored bf16; values are exactly representable).
    q = jnp.arange(hpwp)
    src = 2 * (q // wp) * w + 2 * (q % wp)
    sel = (jnp.arange(hw)[:, None] == src[None, :]).astype(bf16)  # (HW, HpWp)

    def full_spec(shape):
        nd = len(shape)
        return pl.BlockSpec(shape, lambda i, _nd=nd: (0,) * _nd)

    out = pl.pallas_call(
        functools.partial(_fire_kernel, img_w=w, img_hw=hw, nb=nb),
        # TODO(synk): emit bf16 output if downstream tolerates it (halves
        # writeback DMA); kept f32 here to match the module exactly.
        out_shape=jax.ShapeDtypeStruct((cout, n * hpwp), f32),
        grid_spec=pltpu.PrefetchScalarGridSpec(
            num_scalar_prefetch=0,
            grid=grid,
            in_specs=[
                pl.BlockSpec((cin, nb * hw), lambda i: (0, i)),
                full_spec((csq_pad, cin)),
                full_spec((csq_pad, 1)),
                full_spec((cout_pad, 9 * csq_pad)),
                full_spec((cout_pad, 1)),
                full_spec((9, nb * hw)),
                full_spec((hw, hpwp)),
            ],
            out_specs=pl.BlockSpec((cout, nb * hpwp), lambda i: (0, i)),
        ),
        compiler_params=pltpu.CompilerParams(
            dimension_semantics=("parallel",),
            vmem_limit_bytes=32 * 1024 * 1024),
    )(x, wsq_m, bsq_m, wcat_m, bcat_m, masks, sel)

    # (Cout, N*HpWp) -> (N, Cout, Hp, Wp): one cheap transpose of the pooled
    # (smallest) tensor; the kernel-side block stays lane-dense.
    return out.reshape(cout, n, hp, wp).transpose(1, 0, 2, 3)


def _reference_forward(x, wsq, bsq, w1, b1, w3, b3):
    """Pure-JAX NCHW reference matching the PyTorch module (relu, max_pool 2x2)."""
    def conv(inp, wgt, b, pad):
        y = jax.lax.conv_general_dilated(
            inp, wgt, window_strides=(1, 1),
            padding=[(pad, pad), (pad, pad)],
            dimension_numbers=("NCHW", "OIHW", "NCHW"))
        return y + b[None, :, None, None]

    s = jax.nn.relu(conv(x, wsq, bsq, 0))
    e1 = jax.nn.relu(conv(s, w1, b1, 0))
    e3 = jax.nn.relu(conv(s, w3, b3, 1))
    c = jnp.concatenate([e1, e3], axis=1)
    n, ch, hh, ww = c.shape
    return c.reshape(n, ch, hh // 2, 2, ww // 2, 2).max(axis=(3, 5))


if __name__ == "__main__":
    # Shapes consistent with the module constraints:
    # in_channels divisible by squeeze_ratio=6, out_channels even, pooling=2.
    N, Cin, H, W = 2, 12, 16, 16
    out_channels = 8
    squeeze_ratio = 6
    Csq = Cin // squeeze_ratio          # 2
    Cout2 = out_channels // 2           # 4

    key = jax.random.PRNGKey(0)
    ks = jax.random.split(key, 7)
    x = jax.random.normal(ks[0], (N, Cin, H, W), dtype=jnp.float32)

    # Deterministic parameter init (PyTorch Conv2d layout: (out, in, kh, kw)).
    wsq = jax.random.normal(ks[1], (Csq, Cin, 1, 1), dtype=jnp.float32) * 0.2
    bsq = jax.random.normal(ks[2], (Csq,), dtype=jnp.float32) * 0.1
    w1 = jax.random.normal(ks[3], (Cout2, Csq, 1, 1), dtype=jnp.float32) * 0.2
    b1 = jax.random.normal(ks[4], (Cout2,), dtype=jnp.float32) * 0.1
    w3 = jax.random.normal(ks[5], (Cout2, Csq, 3, 3), dtype=jnp.float32) * 0.2
    b3 = jax.random.normal(ks[6], (Cout2,), dtype=jnp.float32) * 0.1

    out = cn_encoder_squeeze_pallas(x, wsq, bsq, w1, b1, w3, b3)
    out = jax.block_until_ready(out)

    ref = _reference_forward(x, wsq, bsq, w1, b1, w3, b3)
    ref = jax.block_until_ready(ref)

    assert out.shape == (N, out_channels, H // 2, W // 2), out.shape
    # bf16 MXU path (per perf review) -> compare at bf16-level tolerance.
    assert jnp.allclose(out, ref, atol=2e-2, rtol=2e-2), (
        float(jnp.max(jnp.abs(out - ref))))

    print("KERNEL_OK")
</pallas_src>

<mosaic_0001>
module attributes {stable_mosaic.version = 11 : i64} {
  func.func @_fire_kernel(%arg0: i32, %arg1: memref<12x512xbf16, #tpu.memory_space<vmem>>, %arg2: memref<8x12xbf16, #tpu.memory_space<vmem>>, %arg3: memref<8x1xf32, #tpu.memory_space<vmem>>, %arg4: memref<8x72xbf16, #tpu.memory_space<vmem>>, %arg5: memref<8x1xf32, #tpu.memory_space<vmem>>, %arg6: memref<9x512xf32, #tpu.memory_space<vmem>>, %arg7: memref<256x64xbf16, #tpu.memory_space<vmem>>, %arg8: memref<8x128xf32, #tpu.memory_space<vmem>>) attributes {dimension_semantics = [#tpu.dimension_semantics<parallel>], iteration_bounds = array<i64: 1>, scalar_prefetch = 0 : i64, scratch_operands = 0 : i64, tpu.core_type = #tpu.core_type<tc>, window_params = [{transform_indices = @transform_0, window_bounds = array<i64: 12, 512>}, {pipeline_mode = #tpu.pipeline_mode<synchronous>, transform_indices = @transform_1, window_bounds = array<i64: 8, 12>}, {pipeline_mode = #tpu.pipeline_mode<synchronous>, transform_indices = @transform_2, window_bounds = array<i64: 8, 1>}, {pipeline_mode = #tpu.pipeline_mode<synchronous>, transform_indices = @transform_3, window_bounds = array<i64: 8, 72>}, {pipeline_mode = #tpu.pipeline_mode<synchronous>, transform_indices = @transform_4, window_bounds = array<i64: 8, 1>}, {pipeline_mode = #tpu.pipeline_mode<synchronous>, transform_indices = @transform_5, window_bounds = array<i64: 9, 512>}, {pipeline_mode = #tpu.pipeline_mode<synchronous>, transform_indices = @transform_6, window_bounds = array<i64: 256, 64>}, {transform_indices = @transform_7, window_bounds = array<i64: 8, 128>}]} {
    %c0 = arith.constant 0 : index
    %c0_0 = arith.constant 0 : index
    %0 = vector.load %arg1[%c0, %c0_0] : memref<12x512xbf16, #tpu.memory_space<vmem>>, vector<12x512xbf16>
    %c0_1 = arith.constant 0 : index
    %c0_2 = arith.constant 0 : index
    %1 = vector.load %arg2[%c0_1, %c0_2] : memref<8x12xbf16, #tpu.memory_space<vmem>>, vector<8x12xbf16>
    %c0_3 = arith.constant 0 : index
    %c0_4 = arith.constant 0 : index
    %2 = vector.load %arg3[%c0_3, %c0_4] : memref<8x1xf32, #tpu.memory_space<vmem>>, vector<8x1xf32>
    %c0_5 = arith.constant 0 : index
    %c0_6 = arith.constant 0 : index
    %3 = vector.load %arg4[%c0_5, %c0_6] : memref<8x72xbf16, #tpu.memory_space<vmem>>, vector<8x72xbf16>
    %c0_7 = arith.constant 0 : index
    %c0_8 = arith.constant 0 : index
    %4 = vector.load %arg5[%c0_7, %c0_8] : memref<8x1xf32, #tpu.memory_space<vmem>>, vector<8x1xf32>
    %c0_9 = arith.constant 0 : index
    %c0_10 = arith.constant 0 : index
    %5 = vector.load %arg6[%c0_9, %c0_10] : memref<9x512xf32, #tpu.memory_space<vmem>>, vector<9x512xf32>
    %c0_11 = arith.constant 0 : index
    %c0_12 = arith.constant 0 : index
    %6 = vector.load %arg7[%c0_11, %c0_12] : memref<256x64xbf16, #tpu.memory_space<vmem>>, vector<256x64xbf16>
    %7 = arith.extf %6 : vector<256x64xbf16> to vector<256x64xf32>
    %cst = arith.constant dense<0.000000e+00> : vector<8x512xf32>
    %8 = tpu.matmul %1, %0, %cst {dimension_numbers = #tpu.dot_dimension_numbers<[1], [0], [0], [1], [0, 0, 1, 1], [], []>} : vector<8x12xbf16>, vector<12x512xbf16>, vector<8x512xf32> -> vector<8x512xf32>
    %9 = vector.broadcast %2 : vector<8x1xf32> to vector<8x512xf32>
    %10 = arith.addf %8, %9 : vector<8x512xf32>
    %cst_13 = arith.constant 0.000000e+00 : f32
    %11 = vector.broadcast %cst_13 : f32 to vector<8x512xf32>
    %12 = arith.maximumf %10, %11 : vector<8x512xf32>
    %c17_i32 = arith.constant 17 : i32
    %13 = tpu.dynamic_rotate %12 by %c17_i32 dim 1 : vector<8x512xf32>, i32 -> vector<8x512xf32>
    %14 = vector.extract_strided_slice %5 {offsets = [0, 0], sizes = [1, 512], strides = [1, 1]} : vector<9x512xf32> to vector<1x512xf32>
    %15 = vector.broadcast %14 : vector<1x512xf32> to vector<8x512xf32>
    %16 = arith.mulf %13, %15 : vector<8x512xf32>
    %c16_i32 = arith.constant 16 : i32
    %17 = tpu.dynamic_rotate %12 by %c16_i32 dim 1 : vector<8x512xf32>, i32 -> vector<8x512xf32>
    %18 = vector.extract_strided_slice %5 {offsets = [1, 0], sizes = [1, 512], strides = [1, 1]} : vector<9x512xf32> to vector<1x512xf32>
    %19 = vector.broadcast %18 : vector<1x512xf32> to vector<8x512xf32>
    %20 = arith.mulf %17, %19 : vector<8x512xf32>
    %c15_i32 = arith.constant 15 : i32
    %21 = tpu.dynamic_rotate %12 by %c15_i32 dim 1 : vector<8x512xf32>, i32 -> vector<8x512xf32>
    %22 = vector.extract_strided_slice %5 {offsets = [2, 0], sizes = [1, 512], strides = [1, 1]} : vector<9x512xf32> to vector<1x512xf32>
    %23 = vector.broadcast %22 : vector<1x512xf32> to vector<8x512xf32>
    %24 = arith.mulf %21, %23 : vector<8x512xf32>
    %c1_i32 = arith.constant 1 : i32
    %25 = tpu.dynamic_rotate %12 by %c1_i32 dim 1 : vector<8x512xf32>, i32 -> vector<8x512xf32>
    %26 = vector.extract_strided_slice %5 {offsets = [3, 0], sizes = [1, 512], strides = [1, 1]} : vector<9x512xf32> to vector<1x512xf32>
    %27 = vector.broadcast %26 : vector<1x512xf32> to vector<8x512xf32>
    %28 = arith.mulf %25, %27 : vector<8x512xf32>
    %c511_i32 = arith.constant 511 : i32
    %29 = tpu.dynamic_rotate %12 by %c511_i32 dim 1 : vector<8x512xf32>, i32 -> vector<8x512xf32>
    %30 = vector.extract_strided_slice %5 {offsets = [5, 0], sizes = [1, 512], strides = [1, 1]} : vector<9x512xf32> to vector<1x512xf32>
    %31 = vector.broadcast %30 : vector<1x512xf32> to vector<8x512xf32>
    %32 = arith.mulf %29, %31 : vector<8x512xf32>
    %c497_i32 = arith.constant 497 : i32
    %33 = tpu.dynamic_rotate %12 by %c497_i32 dim 1 : vector<8x512xf32>, i32 -> vector<8x512xf32>
    %34 = vector.extract_strided_slice %5 {offsets = [6, 0], sizes = [1, 512], strides = [1, 1]} : vector<9x512xf32> to vector<1x512xf32>
    %35 = vector.broadcast %34 : vector<1x512xf32> to vector<8x512xf32>
    %36 = arith.mulf %33, %35 : vector<8x512xf32>
    %c496_i32 = arith.constant 496 : i32
    %37 = tpu.dynamic_rotate %12 by %c496_i32 dim 1 : vector<8x512xf32>, i32 -> vector<8x512xf32>
    %38 = vector.extract_strided_slice %5 {offsets = [7, 0], sizes = [1, 512], strides = [1, 1]} : vector<9x512xf32> to vector<1x512xf32>
    %39 = vector.broadcast %38 : vector<1x512xf32> to vector<8x512xf32>
    %40 = arith.mulf %37, %39 : vector<8x512xf32>
    %c495_i32 = arith.constant 495 : i32
    %41 = tpu.dynamic_rotate %12 by %c495_i32 dim 1 : vector<8x512xf32>, i32 -> vector<8x512xf32>
    %42 = vector.extract_strided_slice %5 {offsets = [8, 0], sizes = [1, 512], strides = [1, 1]} : vector<9x512xf32> to vector<1x512xf32>
    %43 = vector.broadcast %42 : vector<1x512xf32> to vector<8x512xf32>
    %44 = arith.mulf %41, %43 : vector<8x512xf32>
    %45 = tpu.concatenate %16, %20, %24, %28, %12, %32, %36, %40, %44 in 0 : vector<8x512xf32>, vector<8x512xf32>, vector<8x512xf32>, vector<8x512xf32>, vector<8x512xf32>, vector<8x512xf32>, vector<8x512xf32>, vector<8x512xf32>, vector<8x512xf32> -> vector<72x512xf32>
    %46 = arith.truncf %45 : vector<72x512xf32> to vector<72x512xbf16>
    %cst_14 = arith.constant dense<0.000000e+00> : vector<8x512xf32>
    %47 = tpu.matmul %3, %46, %cst_14 {dimension_numbers = #tpu.dot_dimension_numbers<[1], [0], [0], [1], [0, 0, 1, 1], [], []>} : vector<8x72xbf16>, vector<72x512xbf16>, vector<8x512xf32> -> vector<8x512xf32>
    %48 = vector.broadcast %4 : vector<8x1xf32> to vector<8x512xf32>
    %49 = arith.addf %47, %48 : vector<8x512xf32>
    %cst_15 = arith.constant 0.000000e+00 : f32
    %50 = vector.broadcast %cst_15 : f32 to vector<8x512xf32>
    %51 = arith.maximumf %49, %50 : vector<8x512xf32>
    %c511_i32_16 = arith.constant 511 : i32
    %52 = tpu.dynamic_rotate %51 by %c511_i32_16 dim 1 : vector<8x512xf32>, i32 -> vector<8x512xf32>
    %53 = arith.maximumf %51, %52 : vector<8x512xf32>
    %c496_i32_17 = arith.constant 496 : i32
    %54 = tpu.dynamic_rotate %53 by %c496_i32_17 dim 1 : vector<8x512xf32>, i32 -> vector<8x512xf32>
    %55 = arith.maximumf %53, %54 : vector<8x512xf32>
    %56 = vector.extract_strided_slice %55 {offsets = [0, 0], sizes = [8, 256], strides = [1, 1]} : vector<8x512xf32> to vector<8x256xf32>
    %cst_18 = arith.constant dense<0.000000e+00> : vector<8x64xf32>
    %57 = tpu.matmul %56, %7, %cst_18 {dimension_numbers = #tpu.dot_dimension_numbers<[1], [0], [0], [1], [0, 0, 1, 1], [], []>} : vector<8x256xf32>, vector<256x64xf32>, vector<8x64xf32> -> vector<8x64xf32>
    %c0_19 = arith.constant 0 : index
    %c0_20 = arith.constant 0 : index
    %58 = vector.load %arg8[%c0_19, %c0_20] : memref<8x128xf32, #tpu.memory_space<vmem>>, vector<8x64xf32>
    tpu.vector_store %arg8[%c0_19, %c0_20], %57 {strides = array<i32>} : memref<8x128xf32, #tpu.memory_space<vmem>>, vector<8x64xf32>,
    %59 = vector.extract_strided_slice %55 {offsets = [0, 256], sizes = [8, 256], strides = [1, 1]} : vector<8x512xf32> to vector<8x256xf32>
    %cst_21 = arith.constant dense<0.000000e+00> : vector<8x64xf32>
    %60 = tpu.matmul %59, %7, %cst_21 {dimension_numbers = #tpu.dot_dimension_numbers<[1], [0], [0], [1], [0, 0, 1, 1], [], []>} : vector<8x256xf32>, vector<256x64xf32>, vector<8x64xf32> -> vector<8x64xf32>
    %c0_22 = arith.constant 0 : index
    %c64 = arith.constant 64 : index
    %61 = vector.load %arg8[%c0_22, %c64] : memref<8x128xf32, #tpu.memory_space<vmem>>, vector<8x64xf32>
    tpu.vector_store %arg8[%c0_22, %c64], %60 {strides = array<i32>} : memref<8x128xf32, #tpu.memory_space<vmem>>, vector<8x64xf32>,
    return
  }
  func.func @transform_0(%arg0: i32) -> (i32, i32) {
    %c0_i32 = arith.constant 0 : i32
    %c0_i32_0 = arith.constant 0 : i32
    return %c0_i32, %arg0 : i32, i32
  }
  func.func @transform_1(%arg0: i32) -> (i32, i32) {
    %c0_i32 = arith.constant 0 : i32
    %c0_i32_0 = arith.constant 0 : i32
    %c0_i32_1 = arith.constant 0 : i32
    return %c0_i32, %c0_i32_0 : i32, i32
  }
  func.func @transform_2(%arg0: i32) -> (i32, i32) {
    %c0_i32 = arith.constant 0 : i32
    %c0_i32_0 = arith.constant 0 : i32
    %c0_i32_1 = arith.constant 0 : i32
    return %c0_i32, %c0_i32_0 : i32, i32
  }
  func.func @transform_3(%arg0: i32) -> (i32, i32) {
    %c0_i32 = arith.constant 0 : i32
    %c0_i32_0 = arith.constant 0 : i32
    %c0_i32_1 = arith.constant 0 : i32
    return %c0_i32, %c0_i32_0 : i32, i32
  }
  func.func @transform_4(%arg0: i32) -> (i32, i32) {
    %c0_i32 = arith.constant 0 : i32
    %c0_i32_0 = arith.constant 0 : i32
    %c0_i32_1 = arith.constant 0 : i32
    return %c0_i32, %c0_i32_0 : i32, i32
  }
  func.func @transform_5(%arg0: i32) -> (i32, i32) {
    %c0_i32 = arith.constant 0 : i32
    %c0_i32_0 = arith.constant 0 : i32
    %c0_i32_1 = arith.constant 0 : i32
    return %c0_i32, %c0_i32_0 : i32, i32
  }
  func.func @transform_6(%arg0: i32) -> (i32, i32) {
    %c0_i32 = arith.constant 0 : i32
    %c0_i32_0 = arith.constant 0 : i32
    %c0_i32_1 = arith.constant 0 : i32
    return %c0_i32, %c0_i32_0 : i32, i32
  }
  func.func @transform_7(%arg0: i32) -> (i32, i32) {
    %c0_i32 = arith.constant 0 : i32
    %c0_i32_0 = arith.constant 0 : i32
    return %c0_i32, %arg0 : i32, i32
  }
}

</mosaic_0001>

<bundles_post_ra>
// kernel: tpu_custom_call.1
= control target key start
LH: loop header
LB: loop body
LE: loop exit
PB: predicated region body
PF: predicated region fallthrough
CT: control target
= control target key end

     0   :  { %vm133_vm0 = vcmask 1045504   ;;  %v1107_v3 = vmov 0   ;;  %s1615_s0 = inlined_call_operand.vmem [shape: bf16[12,512], index: 0, kind: input, shape index: {}]   ;;  %s1616_s1 = inlined_call_operand.vmem [shape: bf16[8,12], index: 1, kind: input, shape index: {}]   ;;  %s1617_s2 = inlined_call_operand.vmem [shape: f32[8,1], index: 2, kind: input, shape index: {}]   ;;  %s1618_s3 = inlined_call_operand.vmem [shape: bf16[8,72], index: 3, kind: input, shape index: {}]   ;;  %s1619_s4 = inlined_call_operand.vmem [shape: f32[8,1], index: 4, kind: input, shape index: {}]   ;;  %s1620_s5 = inlined_call_operand.vmem [shape: f32[9,512], index: 5, kind: input, shape index: {}]   ;;  %s1621_s6 = inlined_call_operand.vmem [shape: bf16[256,64], index: 6, kind: input, shape index: {}]   ;;  %s1622_s7 = inlined_call_operand.hbm [shape: f32[8,128], index: 7, kind: output, shape index: {}]  }
   0x1   :  { %v1077_v0 = vld [vmem:[%s1615_s0 + $0x4] ss:$16 sps:$4 sm:$0x3f]   ;;  %v1079_v1 = vld [vmem:[%s1615_s0 + $0xc] ss:$16 sps:$4 sm:$0x3f]   ;;  %178 = vmatprep.mubr.bf16.mxu0 %v1107_v3  ;;  %219 = vmatprep.mubr.bf16.mxu1 %v1107_v3 }
   0x2   :  { %824 = vmatprep.subr.msk.bf16.mxu0 %vm133_vm0, %v1077_v0  ;;  %v1081_v2 = vld [vmem:[%s1615_s0] ss:$16 sps:$4 sm:$0x3f]   ;;  %v1082_v4 = vld [vmem:[%s1615_s0 + $0x8] ss:$16 sps:$4 sm:$0x3f]   ;;  %1060 = vset.pattern.permute.xlu0 %v1107_v3 }
   0x3   :  { %v33_v5 = vld [vmem:[%s1617_s2] sm:$0xff]  ;;  %826 = vmatprep.subr.msk.bf16.mxu1 %vm133_vm0, %v1079_v1  ;;  %v135_v6 = vsel %vm133_vm0, %v1081_v2, 0 }
   0x4   :  { %110 = vperm.xlu0 %1060, %v33_v5  }
   0x5   :  { %12 = vsyncpa [#allocation3], 0  ;;  %147 = vmatpush1.bf16.msra.mxu0 %v135_v6  ;;  %v141_v7 = vsel %vm133_vm0, %v1082_v4, 0  ;;  %v32_v8 = vld [vmem:[%s1616_s1] sm:$0xf]  ;;  %vm129_vm1 = vcmask 97280   ;;  %1061 = vset.pattern.permute.xlu1 %v1107_v3  ;;  %v240_v27 = vlaneseq }
   0x6   :  { %188 = vmatpush1.bf16.msra.mxu1 %v141_v7  ;;  %s1108_s0 = smov 17   ;;  %s1109_s1 = smov 16   ;;  %v35_v26 = vld [vmem:[%s1619_s4] sm:$0xff]  ;;  %v1242_v35 = vld [vmem:[%s1620_s5 + $0x18] sm:$0xff]  ;;  %v1283_v57 = vld [vmem:[%s1620_s5 + $0x8] sm:$0xff]  ;;  %vm527_vm10 = vcmask 1043456  }
   0x7   :  { %s1110_s2 = smov 15   ;;  %s1111_s13 = smov 1   ;;  %v248_v30 = vshrl.u32 %v240_v27, 7  ;;  %v1235_v31 = vand.u32 127, %v240_v27  ;;  %v1278_v56 = vld [vmem:[%s1620_s5] sm:$0xff]  ;;  %v1288_v58 = vld [vmem:[%s1620_s5 + $0x10] sm:$0xff] }
   0x8   :  { %825 = vmatmul.mubr.msk.bf16.vlgmr.msra.gmra.mrb[0].mxu0 %vm129_vm1, %v32_v8  ;;  %s1112_s14 = smov 127   ;;  %s1113_s15 = smov 113   ;;  %vm523_vm11 = vcmask 588800   ;;  %vm728_vm12 = vcmask 523264   ;;  %vm804_vm13 = vcmask 1048064  }
   0x9   :  { %827 = vmatmul.mubr.msk.bf16.vlgmr.msra.gmra.mrb[0].mxu1 %vm129_vm1, %v32_v8  ;;  %572 = vmatprep.mubr.bf16.mxu0 %v1107_v3  ;;  %s1114_s16 = smov 112   ;;  %s1115_s17 = smov 111   ;;  %v1237_v34 = vsub.s32 0, %v248_v30  ;;  %vm242_vm2 = vcmp.lt.s32.totalorder %v1235_v31, 17  ;;  %v1245_v36 = vsub.s32 1, %v248_v30  ;;  %vm275_vm3 = vcmp.lt.s32.totalorder %v1235_v31, 16 }
   0xa   :  { %613 = vmatprep.mubr.bf16.mxu1 %v1107_v3  ;;  %v1290_v59 = vsub.s32 2, %v248_v30  ;;  %v1294_v61 = vsub.s32 3, %v248_v30  ;;  %v1304_v2 = vsub.s32 5, %v248_v30  ;;  %vm308_vm4 = vcmp.lt.s32.totalorder %v1235_v31, 15 }
   0xb   :  { %v262_v39 = vrot.slane %v1242_v35, %v1237_v34  ;;  %v295_v40 = vrot.slane %v1242_v35, %v1245_v36  ;;  %v250_v63 = vrot.slane %v1278_v56, %v1237_v34  ;;  %v287_v0 = vrot.slane %v1283_v57, %v1245_v36 }
   0xc   :  { %v291_v1 = vrot.slane %v1288_v58, %v1245_v36  ;;  %v283_v3 = vrot.slane %v1278_v56, %v1245_v36  ;;  %v320_v4 = vrot.slane %v1283_v57, %v1290_v59  ;;  %v324_v5 = vrot.slane %v1288_v58, %v1290_v59 }
   0xd   :  { %v316_v6 = vrot.slane %v1278_v56, %v1290_v59  ;;  %v328_v7 = vrot.slane %v1242_v35, %v1290_v59  ;;  %vm341_vm5 = vcmp.lt.s32.totalorder %v1235_v31, 1  ;;  %vm374_vm6 = vcmp.lt.s32.totalorder %v1235_v31, 127 }
   0xe   :  { %vm407_vm7 = vcmp.lt.s32.totalorder %v1235_v31, 113  ;;  %vm440_vm8 = vcmp.lt.s32.totalorder %v1235_v31, 112  ;;  %vm473_vm9 = vcmp.lt.s32.totalorder %v1235_v31, 111 }
  0x83   :  { %v111_v9 = vpop.permute.xlu0 %110 }
  0xdb   :  { %v180_v10 = vpop.f32.mrb[0].mxu0 }
  0xdc   :  { %v181_v11 = vadd.f32 %v180_v10, %v111_v9  ;;  %v221_v12 = vpop.f32.mrb[0].mxu1  ;;  %v182_v13 = vpop.f32.mrb[1].mxu0 }
  0xdd   :  { %v222_v14 = vadd.f32 %v221_v12, %v111_v9  ;;  %v223_v15 = vpop.f32.mrb[1].mxu1  ;;  %v184_v16 = vpop.f32.mrb[2].mxu0  ;;  %v183_v23 = vadd.f32 %v182_v13, %v111_v9  ;;  %v357_v12 = vrot.slane %v1288_v58, %v1294_v61  ;;  %v349_v13 = vrot.slane %v1278_v56, %v1294_v61 }
  0xde   :  { %v1176_v17 = vmax.f32 %v181_v11, 0.0  ;;  %v224_v18 = vadd.f32 %v223_v15, %v111_v9  ;;  %v225_v19 = vpop.f32.mrb[2].mxu1  ;;  %v185_v20 = vpop.f32.mrb[3].mxu0  ;;  %v1320_v9 = vsub.s32 6, %v248_v30  ;;  %v353_v11 = vrot.slane %v1283_v57, %v1294_v61 }
  0xdf   :  { %v1178_v21 = vmax.f32 %v222_v14, 0.0  ;;  %v226_v22 = vpop.f32.mrb[3].mxu1  ;;  %v1189_v25 = vmax.f32 %v183_v23, 0.0  ;;  %v361_v15 = vrot.slane %v1242_v35, %v1294_v61  ;;  %v382_v16 = vrot.slane %v1278_v56, %v1304_v2 }
  0xe0   :  { %232 = vrot.lane.b32.xlu0 %v1176_v17, %s1108_s0  ;;  %v1184_v24 = vmax.f32 %v224_v18, 0.0  ;;  %v1337_v18 = vsub.s32 7, %v248_v30  ;;  %v386_v20 = vrot.slane %v1283_v57, %v1304_v2  ;;  %v390_v22 = vrot.slane %v1288_v58, %v1304_v2 }
  0xe1   :  { %236 = vrot.lane.b32.xlu1 %v1178_v21, %s1108_s0  ;;  %v394_v23 = vrot.slane %v1242_v35, %v1304_v2  ;;  %v419_v30 = vrot.slane %v1283_v57, %v1320_v9 }
  0xe2   :  { %v460_v61 = vrot.slane %v1242_v35, %v1337_v18 }
  0xe4   :  { %238 = vrot.lane.b32.xlu0 %v1184_v24, %s1108_s0 }
  0xe5   :  { %267 = vrot.lane.b32.xlu1 %v1176_v17, %s1109_s1 }
  0xe8   :  { %269 = vrot.lane.b32.xlu0 %v1189_v25, %s1109_s1 }
  0xe9   :  { %271 = vrot.lane.b32.xlu1 %v1178_v21, %s1109_s1 }
  0xec   :  { %273 = vrot.lane.b32.xlu0 %v1184_v24, %s1109_s1 }
  0xed   :  { %300 = vrot.lane.b32.xlu1 %v1176_v17, %s1110_s2 }
  0xf0   :  { %302 = vrot.lane.b32.xlu0 %v1189_v25, %s1110_s2 }
  0xf1   :  { %304 = vrot.lane.b32.xlu1 %v1178_v21, %s1110_s2 }
  0xf4   :  { %306 = vrot.lane.b32.xlu0 %v1184_v24, %s1110_s2 }
  0xf5   :  { %333 = vrot.lane.b32.xlu1 %v1176_v17, %s1111_s13 }
  0xf8   :  { %335 = vrot.lane.b32.xlu0 %v1189_v25, %s1111_s13 }
  0xf9   :  { %337 = vrot.lane.b32.xlu1 %v1178_v21, %s1111_s13 }
  0xfc   :  { %339 = vrot.lane.b32.xlu0 %v1184_v24, %s1111_s13 }
  0xfd   :  { %366 = vrot.lane.b32.xlu1 %v1176_v17, %s1112_s14 }
 0x100   :  { %368 = vrot.lane.b32.xlu0 %v1189_v25, %s1112_s14 }
 0x101   :  { %370 = vrot.lane.b32.xlu1 %v1178_v21, %s1112_s14 }
 0x104   :  { %372 = vrot.lane.b32.xlu0 %v1184_v24, %s1112_s14 }
 0x105   :  { %399 = vrot.lane.b32.xlu1 %v1176_v17, %s1113_s15 }
 0x108   :  { %401 = vrot.lane.b32.xlu0 %v1189_v25, %s1113_s15 }
 0x109   :  { %403 = vrot.lane.b32.xlu1 %v1178_v21, %s1113_s15 }
 0x10c   :  { %405 = vrot.lane.b32.xlu0 %v1184_v24, %s1113_s15 }
 0x10d   :  { %234 = vrot.lane.b32.xlu1 %v1189_v25, %s1108_s0 }
 0x110   :  { %434 = vrot.lane.b32.xlu0 %v1189_v25, %s1114_s16 }
 0x111   :  { %432 = vrot.lane.b32.xlu1 %v1176_v17, %s1114_s16 }
 0x114   :  { %438 = vrot.lane.b32.xlu0 %v1184_v24, %s1114_s16 }
 0x115   :  { %436 = vrot.lane.b32.xlu1 %v1178_v21, %s1114_s16 }
 0x118   :  { %467 = vrot.lane.b32.xlu0 %v1189_v25, %s1115_s17 }
 0x119   :  { %465 = vrot.lane.b32.xlu1 %v1176_v17, %s1115_s17 }
 0x11c   :  { %471 = vrot.lane.b32.xlu0 %v1184_v24, %s1115_s17 }
 0x11d   :  { %469 = vrot.lane.b32.xlu1 %v1178_v21, %s1115_s17 }
 0x121   :  { %520 = vperm.xlu1 %1061, %v35_v26  }
 0x152   :  { %v1231_v28 = vpop.permute.xlu0 %232 }
 0x153   :  { %v1233_v29 = vpop.permute.xlu1 %236 }
 0x156   :  { %v239_v32 = vpop.permute.xlu0 %238 }
 0x157   :  { %v268_v33 = vpop.permute.xlu1 %267  ;;  %v243_v41 = vsel %vm242_vm2, %v1233_v29, %v239_v32  ;;  %v246_v19 = vsel %vm242_vm2, %v239_v32, %v1231_v28  ;;  %v254_v32 = vrot.slane %v1283_v57, %v1237_v34 }
 0x158   :  { %v266_v45 = vmul.f32 %v262_v39, %v243_v41  ;;  %v258_v41 = vrot.slane %v1288_v58, %v1237_v34  ;;  %v452_v34 = vrot.slane %v1283_v57, %v1337_v18 }
 0x15a   :  { %v270_v37 = vpop.permute.xlu0 %269 }
 0x15b   :  { %v272_v38 = vpop.permute.xlu1 %271  ;;  %v278_v26 = vsel %vm275_vm3, %v268_v33, %v270_v37 }
 0x15c   :  { %v277_v39 = vsel %vm275_vm3, %v270_v37, %v272_v38 }
 0x15e   :  { %v274_v42 = vpop.permute.xlu0 %273 }
 0x15f   :  { %v1255_v43 = vpop.permute.xlu1 %300  ;;  %v276_v44 = vsel %vm275_vm3, %v272_v38, %v274_v42  ;;  %v279_v10 = vsel %vm275_vm3, %v274_v42, %v268_v33  ;;  %v427_v42 = vrot.slane %v1242_v35, %v1320_v9  ;;  %v297_v38 = vmul.f32 %v287_v0, %v278_v26 }
 0x160   :  { %v299_v46 = vmul.f32 %v295_v40, %v276_v44  ;;  %v296_v27 = vmul.f32 %v283_v3, %v279_v10  ;;  %v263_v44 = vmul.f32 %v250_v63, %v246_v19  ;;  %v298_v63 = vmul.f32 %v291_v1, %v277_v39 }
 0x162   :  { %v1259_v47 = vpop.permute.xlu0 %302  ;;  %v501_v48 = vpack.c.bf16 %v299_v46, %v266_v45  ;;  %v498_v3 = vpack.c.bf16 %v296_v27, %v263_v44 }
 0x163   :  { %v1261_v49 = vpop.permute.xlu1 %304  ;;  %v311_v45 = vsel %vm308_vm4, %v1255_v43, %v1259_v47 }
 0x164   :  { %581 = vmatprep.subr.bf16.mxu1 %v501_v48  ;;  %v456_v48 = vrot.slane %v1288_v58, %v1337_v18  ;;  %v310_v10 = vsel %vm308_vm4, %v1259_v47, %v1261_v49  ;;  %v330_v26 = vmul.f32 %v320_v4, %v311_v45 }
 0x166   :  { %v1263_v50 = vpop.permute.xlu0 %306 }
 0x167   :  { %v1265_v51 = vpop.permute.xlu1 %333  ;;  %v309_v33 = vsel %vm308_vm4, %v1261_v49, %v1263_v50 }
 0x168   :  { %v332_v39 = vmul.f32 %v328_v7, %v309_v33  ;;  %v331_v7 = vmul.f32 %v324_v5, %v310_v10 }
 0x16a   :  { %v1267_v52 = vpop.permute.xlu0 %335 }
 0x16b   :  { %v1269_v53 = vpop.permute.xlu1 %337  ;;  %v344_v0 = vsel %vm341_vm5, %v1265_v51, %v1267_v52 }
 0x16c   :  { %v343_v35 = vsel %vm341_vm5, %v1267_v52, %v1269_v53 }
 0x16d   :  { %v364_v44 = vmul.f32 %v357_v12, %v343_v35 }
 0x16e   :  { %v1271_v54 = vpop.permute.xlu0 %339 }
 0x16f   :  { %v1273_v55 = vpop.permute.xlu1 %366  ;;  %v342_v46 = vsel %vm341_vm5, %v1269_v53, %v1271_v54  ;;  %v345_v47 = vsel %vm341_vm5, %v1271_v54, %v1265_v51  ;;  %v312_v51 = vsel %vm308_vm4, %v1263_v50, %v1255_v43  ;;  %v363_v53 = vmul.f32 %v353_v11, %v344_v0 }
 0x170   :  { %v365_v27 = vmul.f32 %v361_v15, %v342_v46  ;;  %v362_v45 = vmul.f32 %v349_v13, %v345_v47  ;;  %v329_v11 = vmul.f32 %v316_v6, %v312_v51 }
 0x172   :  { %v1292_v60 = vpop.permute.xlu0 %368  ;;  %v505_v13 = vpack.c.bf16 %v365_v27, %v332_v39  ;;  %v502_v5 = vpack.c.bf16 %v362_v45, %v329_v11 }
 0x173   :  { %v1296_v62 = vpop.permute.xlu1 %370 }
 0x176   :  { %v1318_v8 = vpop.permute.xlu0 %372 }
 0x177   :  { %v1330_v14 = vpop.permute.xlu1 %399  ;;  %v378_v4 = vsel %vm374_vm6, %v1318_v8, %v1273_v55  ;;  %v375_v12 = vsel %vm374_vm6, %v1296_v62, %v1318_v8 }
 0x178   :  { %v397_v6 = vmul.f32 %v390_v22, %v375_v12 }
 0x17a   :  { %v1352_v36 = vpop.permute.xlu0 %401  ;;  %v508_v0 = vpack.c.bf16 %v397_v6, %v1178_v21  ;;  %v1623_v21 = vrot.slane %v1278_v56, %v1337_v18 }
 0x17b   :  { %v1358_v40 = vpop.permute.xlu1 %403 }
 0x17c   :  { %v409_v8 = vsel %vm407_vm7, %v1352_v36, %v1358_v40 }
 0x17e   :  { %v406_v19 = vpop.permute.xlu0 %405 }
 0x17f   :  { %v235_v1 = vpop.permute.xlu1 %234 }
 0x180   :  { %v244_v49 = vsel %vm242_vm2, %v235_v1, %v1233_v29  ;;  %v245_v52 = vsel %vm242_vm2, %v1231_v28, %v235_v1  ;;  %v376_v29 = vsel %vm374_vm6, %v1292_v60, %v1296_v62  ;;  %v377_v28 = vsel %vm374_vm6, %v1273_v55, %v1292_v60 }
 0x181   :  { %v264_v54 = vmul.f32 %v254_v32, %v245_v52  ;;  %v265_v15 = vmul.f32 %v258_v41, %v244_v49  ;;  %v398_v1 = vmul.f32 %v394_v23, %v378_v4  ;;  %v396_v32 = vmul.f32 %v386_v20, %v376_v29 }
 0x182   :  { %v435_v46 = vpop.permute.xlu0 %434  ;;  %v411_v55 = vsel %vm407_vm7, %v406_v19, %v1330_v14  ;;  %v503_v60 = vpack.c.bf16 %v363_v53, %v330_v26  ;;  %v504_v23 = vpack.c.bf16 %v364_v44, %v331_v7  ;;  %v395_v59 = vmul.f32 %v382_v16, %v377_v28 }
 0x183   :  { %v500_v37 = vpack.c.bf16 %v298_v63, %v265_v15  ;;  %v433_v43 = vpop.permute.xlu1 %432  ;;  %v499_v50 = vpack.c.bf16 %v297_v38, %v264_v54  ;;  %v509_v16 = vpack.c.bf16 %v398_v1, %v1184_v24  ;;  %v431_v33 = vmul.f32 %v427_v42, %v411_v55 }
 0x184   :  { %v443_v38 = vsel %vm440_vm8, %v433_v43, %v435_v46  ;;  %v415_v24 = vrot.slane %v1278_v56, %v1320_v9  ;;  %v408_v42 = vsel %vm407_vm7, %v1358_v40, %v406_v19  ;;  %v429_v26 = vmul.f32 %v419_v30, %v409_v8  ;;  %v830_v56 = vld [vmem:[%s1620_s5 + $0x30] ss:$0 sm:$0xff] }
 0x185   :  { %540 = vmatprep.subr.bf16.mxu0 %v499_v50  ;;  %582 = vmatpush1.bf16.msra.mxu1 %v500_v37  ;;  %v506_v35 = vpack.c.bf16 %v395_v59, %v1176_v17  ;;  %v461_v47 = vmul.f32 %v1623_v21, %v443_v38  ;;  %v829_v17 = vld [vmem:[%s1620_s5 + $0x28] ss:$0 sm:$0xff] }
 0x186   :  { %541 = vmatpush1.bf16.msra.mxu0 %v498_v3  ;;  %583 = vmatprep.subr.bf16.mxu1 %v505_v13  ;;  %v439_v62 = vpop.permute.xlu0 %438  ;;  %v507_v3 = vpack.c.bf16 %v396_v32, %v1189_v25  ;;  %v410_v25 = vsel %vm407_vm7, %v1330_v14, %v1352_v36  ;;  %v1624_v14 = vrot.slane %v1288_v58, %v1320_v9  ;;  %v908_v38 = vld [vmem:[%s1621_s6 + $0x48] sm:$0xff]  }
 0x187   :  { %v437_v20 = vpop.permute.xlu1 %436  ;;  %542 = vmatprep.subr.bf16.mxu0 %v503_v60  ;;  %v444_v41 = vsel %vm440_vm8, %v439_v62, %v433_v43  ;;  %v428_v4 = vmul.f32 %v415_v24, %v410_v25  ;;  %v34_v43 = vld [vmem:[%s1618_s3] sm:$0xf]  ;;  %v901_v24 = vld [vmem:[%s1621_s6 + $0x10] sm:$0xff]   ;;  %v904_v25 = vld [vmem:[%s1621_s6 + $0x28] sm:$0xff]  }
 0x188   :  { %v442_v37 = vsel %vm440_vm8, %v435_v46, %v437_v20  ;;  %v441_v2 = vsel %vm440_vm8, %v437_v20, %v439_v62  ;;  %v464_v22 = vmul.f32 %v460_v61, %v444_v41  ;;  %v828_v61 = vld [vmem:[%s1620_s5 + $0x20] ss:$0 sm:$0xff]  ;;  %v430_v57 = vmul.f32 %v1624_v14, %v408_v42  ;;  %v910_v42 = vld [vmem:[%s1621_s6 + $0x58] sm:$0xff]  }
 0x189   :  { %v462_v63 = vmul.f32 %v452_v34, %v442_v37  ;;  %584 = vmatpush1.bf16.msra.mxu1 %v504_v23  ;;  %v463_v40 = vmul.f32 %v456_v48, %v441_v2  ;;  %v831_v48 = vld [vmem:[%s1620_s5 + $0x38] ss:$0 sm:$0xff]  ;;  %v510_v52 = vpack.c.bf16 %v461_v47, %v428_v4  ;;  %v907_v2 = vld [vmem:[%s1621_s6 + $0x40] sm:$0xff]  }
 0x18a   :  { %543 = vmatpush1.bf16.msra.mxu0 %v502_v5  ;;  %585 = vmatprep.subr.bf16.mxu1 %v509_v16  ;;  %v468_v10 = vpop.permute.xlu0 %467  ;;  %v513_v34 = vpack.c.bf16 %v464_v22, %v431_v33  ;;  %v837_v22 = vld [vmem:[%s1621_s6] sm:$0xff]  }
 0x18b   :  { %v466_v19 = vpop.permute.xlu1 %465  ;;  %544 = vmatprep.subr.bf16.mxu0 %v507_v3  ;;  %v511_v36 = vpack.c.bf16 %v462_v63, %v429_v26  ;;  %v512_v9 = vpack.c.bf16 %v463_v40, %v430_v57  ;;  %v900_v63 = vld [vmem:[%s1621_s6 + $0x8] sm:$0xff]   ;;  %v909_v3 = vld [vmem:[%s1621_s6 + $0x50] sm:$0xff]  }
 0x18c   :  { %v476_v27 = vsel %vm473_vm9, %v466_v19, %v468_v10  ;;  %v913_v26 = vld [vmem:[%s1621_s6 + $0x70] sm:$0xff]  }
 0x18d   :  { %v494_v30 = vmul.f32 %v828_v61, %v476_v27  ;;  %586 = vmatpush1.bf16.msra.mxu1 %v508_v0  ;;  %v902_v61 = vld [vmem:[%s1621_s6 + $0x18] sm:$0xff]   ;;  %v912_v0 = vld [vmem:[%s1621_s6 + $0x68] sm:$0xff]   ;;  %v905_v40 = vld [vmem:[%s1621_s6 + $0x30] sm:$0xff]  }
 0x18e   :  { %545 = vmatpush1.bf16.msra.mxu0 %v506_v35  ;;  %587 = vmatprep.subr.bf16.mxu1 %v513_v34  ;;  %v472_v58 = vpop.permute.xlu0 %471  ;;  %v903_v34 = vld [vmem:[%s1621_s6 + $0x20] sm:$0xff]   ;;  %v906_v35 = vld [vmem:[%s1621_s6 + $0x38] sm:$0xff]  }
 0x18f   :  { %v470_v18 = vpop.permute.xlu1 %469  ;;  %546 = vmatprep.subr.bf16.mxu0 %v511_v36  ;;  %v477_v49 = vsel %vm473_vm9, %v472_v58, %v466_v19  ;;  %v514_v15 = vpack.c.bf16 %v494_v30, %v494_v30  ;;  %v914_v19 = vld [vmem:[%s1621_s6 + $0x78] sm:$0xff]  }
 0x190   :  { %v475_v51 = vsel %vm473_vm9, %v468_v10, %v470_v18  ;;  %v474_v53 = vsel %vm473_vm9, %v470_v18, %v472_v58  ;;  %v497_v54 = vmul.f32 %v831_v48, %v477_v49  ;;  %v911_v10 = vld [vmem:[%s1621_s6 + $0x60] sm:$0xff]   ;;  %s1116_s6 = smov 64  }
 0x191   :  { %v495_v39 = vmul.f32 %v829_v17, %v475_v51  ;;  %v496_v44 = vmul.f32 %v830_v56, %v474_v53  ;;  %588 = vmatpush1.bf16.msra.mxu1 %v512_v9  ;;  %v529_v28 = vsel %vm527_vm10, %v514_v15, 0 }
 0x192   :  { %v517_v45 = vpack.c.bf16 %v497_v54, %v497_v54  ;;  %547 = vmatpush1.bf16.msra.mxu0 %v510_v52 }
 0x193   :  { %v515_v29 = vpack.c.bf16 %v495_v39, %v495_v39  ;;  %v516_v46 = vpack.c.bf16 %v496_v44, %v496_v44 }
 0x194   :  { %834 = vmatprep.subr.msk.bf16.mxu1 %vm527_vm10, %v517_v45 }
 0x195   :  { %832 = vmatprep.subr.msk.bf16.mxu0 %vm527_vm10, %v515_v29  ;;  %v535_v1 = vsel %vm527_vm10, %v516_v46, 0 }
 0x196   :  { %549 = vmatpush1.bf16.msra.mxu0 %v529_v28  ;;  %590 = vmatpush1.bf16.msra.mxu1 %v535_v1 }
 0x197   :  { %1018 = vmatprep.subr.bf16.mxu1 %v907_v2  ;;  %986 = vmatprep.subr.bf16.mxu0 %v907_v2 }
 0x199   :  { %833 = vmatmul.mubr.msk.bf16.vlgmr.msra.gmra.mrb[4].mxu0 %vm523_vm11, %v34_v43  ;;  %835 = vmatmul.mubr.msk.bf16.vlgmr.msra.gmra.mrb[4].mxu1 %vm523_vm11, %v34_v43 }
 0x19a   :  { %1020 = vmatpush3.bf16.msra.mxu1 %v837_v22  ;;  %988 = vmatpush3.bf16.msra.mxu0 %v837_v22 }
 0x19b   :  { %1022 = vmatprep.subr.bf16.mxu1 %v908_v38  ;;  %990 = vmatprep.subr.bf16.mxu0 %v908_v38 }
 0x19e   :  { %1024 = vmatpush3.bf16.msra.mxu1 %v900_v63  ;;  %992 = vmatpush3.bf16.msra.mxu0 %v900_v63 }
 0x19f   :  { %1026 = vmatprep.subr.bf16.mxu1 %v909_v3  ;;  %994 = vmatprep.subr.bf16.mxu0 %v909_v3 }
 0x1a0   :  { %v521_v50 = vpop.permute.xlu1 %520 }
 0x1a2   :  { %1028 = vmatpush3.bf16.msra.mxu1 %v901_v24  ;;  %996 = vmatpush3.bf16.msra.mxu0 %v901_v24 }
 0x1a3   :  { %1030 = vmatprep.subr.bf16.mxu1 %v910_v42  ;;  %998 = vmatprep.subr.bf16.mxu0 %v910_v42 }
 0x1a6   :  { %1032 = vmatpush3.bf16.msra.mxu1 %v902_v61  ;;  %1000 = vmatpush3.bf16.msra.mxu0 %v902_v61 }
 0x1a7   :  { %1034 = vmatprep.subr.bf16.mxu1 %v911_v10  ;;  %1002 = vmatprep.subr.bf16.mxu0 %v911_v10 }
 0x1aa   :  { %1036 = vmatpush3.bf16.msra.mxu1 %v903_v34  ;;  %1004 = vmatpush3.bf16.msra.mxu0 %v903_v34 }
 0x1ab   :  { %1038 = vmatprep.subr.bf16.mxu1 %v912_v0  ;;  %1006 = vmatprep.subr.bf16.mxu0 %v912_v0 }
 0x1ae   :  { %1040 = vmatpush3.bf16.msra.mxu1 %v904_v25  ;;  %1008 = vmatpush3.bf16.msra.mxu0 %v904_v25 }
 0x1af   :  { %1042 = vmatprep.subr.bf16.mxu1 %v913_v26  ;;  %1010 = vmatprep.subr.bf16.mxu0 %v913_v26 }
 0x1b2   :  { %1044 = vmatpush3.bf16.msra.mxu1 %v905_v40  ;;  %1012 = vmatpush3.bf16.msra.mxu0 %v905_v40 }
 0x1b3   :  { %1046 = vmatprep.subr.bf16.mxu1 %v914_v19  ;;  %1014 = vmatprep.subr.bf16.mxu0 %v914_v19 }
 0x1b6   :  { %1048 = vmatpush3.bf16.msra.mxu1 %v906_v35  ;;  %1016 = vmatpush3.bf16.msra.mxu0 %v906_v35 }
 0x26c   :  { %v574_v7 = vpop.f32.mrb[4].mxu0  ;;  %v615_v11 = vpop.f32.mrb[4].mxu1 }
 0x26d   :  { %v1506_v12 = vadd.f32 %v574_v7, %v521_v50  ;;  %v1508_v13 = vadd.f32 %v615_v11, %v521_v50  ;;  %v576_v32 = vpop.f32.mrb[5].mxu0  ;;  %v617_v55 = vpop.f32.mrb[5].mxu1 }
 0x26e   :  { %v1510_v60 = vadd.f32 %v576_v32, %v521_v50  ;;  %v1512_v23 = vadd.f32 %v617_v55, %v521_v50  ;;  %v578_v5 = vpop.f32.mrb[6].mxu0  ;;  %v619_v59 = vpop.f32.mrb[6].mxu1 }
 0x26f   :  { %v622_v62 = vmax.f32 %v1506_v12, 0.0  ;;  %v624_v6 = vmax.f32 %v1508_v13, 0.0  ;;  %v579_v8 = vpop.f32.mrb[7].mxu0  ;;  %v620_v20 = vpop.f32.mrb[7].mxu1 }
 0x270   :  { %v623_v41 = vmax.f32 %v1510_v60, 0.0  ;;  %v625_v16 = vmax.f32 %v1512_v23, 0.0 }
 0x272   :  { %v1062_v33 = vpack.i.bf16 %v623_v41, %v622_v62  ;;  %v1067_v37 = vpack.i.bf16 %v624_v6, %v625_v16 }
 0x274   :  { %1063 = vrot.lane.b32.xlu0 %v1062_v33, %s1112_s14  ;;  %1068 = vrot.lane.b32.xlu1 %v1067_v37, %s1112_s14 }
 0x2e6   :  { %v1069_v21 = vpop.permute.xlu1 %1068  ;;  %v1064_v47 = vpop.permute.xlu0 %1063 }
 0x2e7   :  { %v1071_v27 = vunpack.i.h.bf16 %v1069_v21  ;;  %v1070_v14 = vunpack.i.l.bf16 %v1069_v21  ;;  %v1066_v57 = vunpack.i.h.bf16 %v1064_v47  ;;  %v1065_v30 = vunpack.i.l.bf16 %v1064_v47 }
 0x2e9   :  { %v636_v36 = vsel %vm374_vm6, %v1065_v30, %v1066_v57  ;;  %v637_v48 = vsel %vm374_vm6, %v1070_v14, %v1065_v30  ;;  %v634_v4 = vsel %vm374_vm6, %v1071_v27, %v1070_v14  ;;  %v635_v18 = vsel %vm374_vm6, %v1066_v57, %v1071_v27 }
 0x2ea   :  { %v640_v17 = vmax.f32 %v624_v6, %v634_v4  ;;  %v638_v56 = vmax.f32 %v622_v62, %v636_v36  ;;  %v641_v58 = vmax.f32 %v625_v16, %v637_v48  ;;  %v639_v49 = vmax.f32 %v623_v41, %v635_v18 }
 0x2ec   :  { %646 = vrot.lane.b32.xlu1 %v640_v17, %s1114_s16  ;;  %v1072_v9 = vpack.i.bf16 %v641_v58, %v638_v56 }
 0x2ee   :  { %1073 = vrot.lane.b32.xlu0 %v1072_v9, %s1114_s16 }
 0x2f2   :  { %644 = vrot.lane.b32.xlu0 %v639_v49, %s1114_s16  ;;  %s1117_s16 = smov [#allocation2]  }
 0x2f3   :  { %s812_s13 = sshll.u32 %s1117_s16, 4  ;;  %s813_s13 = int_to_ptr.vmem [resolvable:$true] %s812_s13 }
 0x2f4   :  { %s1083_s15 = scalar_lea.vmem %s813_s13, 128  ;;  %p1088_p1 = scmp.lt.s32.totalorder %s813_s13, %s813_s13 }
 0x2f5   :  { %p1084_p0 = scmp.ne.s32.totalorder %s813_s13, %s1083_s15  ;;  %p1089_p2 = scmp.lt.s32.totalorder %s1083_s15, %s1083_s15 }
 0x2f7   :  { %p1090_p3 = por %p1089_p2, %p1088_p1 }
 0x2f9   :  { %p1091_p4 = pnand %p1090_p3, %p1084_p0 }
 0x35e   :  { %v647_v54 = vpop.permute.xlu1 %646 }
 0x360   :  { %v1074_v52 = vpop.permute.xlu0 %1073 }
 0x361   :  { %v1076_v51 = vunpack.i.h.bf16 %v1074_v52  ;;  %v1075_v53 = vunpack.i.l.bf16 %v1074_v52 }
 0x363   :  { %v650_v15 = vsel %vm440_vm8, %v647_v54, %v1076_v51  ;;  %v653_v39 = vsel %vm440_vm8, %v1076_v51, %v1075_v53 }
 0x364   :  { %v656_v44 = vmax.f32 %v640_v17, %v650_v15  ;;  %v645_v45 = vpop.permute.xlu0 %644  ;;  %v657_v29 = vmax.f32 %v641_v58, %v653_v39 }
 0x365   :  { %v651_v46 = vsel %vm440_vm8, %v645_v45, %v647_v54  ;;  %v652_v28 = vsel %vm440_vm8, %v1075_v53, %v645_v45 }
 0x366   :  { %v654_v1 = vmax.f32 %v638_v56, %v652_v28  ;;  %v655_v43 = vmax.f32 %v639_v49, %v651_v46  ;;  %794 = vmatprep.mubr.f32.mxu1 %v657_v29 }
 0x367   :  { %795 = vmatmul.mubr.f32.vlgmr.msra.gmra.mrb[8].mxu1 %v656_v44 }
 0x368   :  { %722 = vmatprep.mubr.f32.mxu0 %v655_v43 }
 0x369   :  { %723 = vmatmul.mubr.f32.vlgmr.msra.gmra.mrb[8].mxu0 %v654_v1 }
 0x43a   :  { %v982_v50 = vpop.f32.mrb[8].mxu1 }
 0x43b   :  { %v983_v7 = vpop.f32.mrb[9].mxu1 }
 0x43c   :  { %v984_v11 = vadd.f32 %v983_v7, %v982_v50  ;;  %v947_v12 = vpop.f32.mrb[8].mxu0 }
 0x43d   :  { %v948_v13 = vpop.f32.mrb[9].mxu0 }
 0x43e   :  { %v949_v32 = vadd.f32 %v948_v13, %v947_v12  ;;  %801 = vrot.lane.b32.xlu1 %v984_v11, %s1116_s6 }
 0x440   :  { %729 = vst.msk [vmem:[#allocation2] sm:$0xff] %vm728_vm12, %v949_v32 }
 0x4b0   :  { %v802_v31 = vpop.permute.xlu1 %801 }
 0x4b1   :  { %805 = vst.msk [vmem:[#allocation2] sm:$0xff] %vm804_vm13, %v802_v31 }
 0x4b2   :  { %1094 = shalt.err (!%p1091_p4)
}
 0x4b3   :  { %s1095_s19 = scalar_lea.hbm %s1622_s7, 128 }
 0x4b4   :  { %p1096_p5 = scmp.ne.s32.totalorder %s1622_s7, %s1095_s19  ;;  %p1099_p6 = scmp.lt.u32.totalorder %s1095_s19, %s1622_s7 }
 0x4b6   :  { %p1101_p7 = pnand %p1099_p6, %p1096_p5 }
 0x4b8   :  { %1104 = shalt.err (!%p1101_p7)
}
 0x4b9   :  { %815 = dma.vmem_to_hbm [thread:$0]  %s813_s13, 128, %s1622_s7, [#allocation3]  }
 0x4ba   :  { %1105 = dma.done.wait [#allocation3], 128  }
 0x4bb   :  { %1106 = vsyncadd [#allocation3], 4294967168 }
 0x4bc   :  { %819 = vsyncpa [#allocation3], 1 }

</bundles_post_ra>
